<compile_context>
chip_gen: v7x
topology: tpu7x:2x2x1
jax: 0.10.0
libtpu: 0.0.40
codegen_flags: <defaults>
</compile_context>

<pallas_src>
import jax
import jax.numpy as jnp
from jax.experimental import pallas as pl
from jax.experimental.pallas import tpu as pltpu

LANE = 128     # vreg lane width
SUBLANE = 8    # f32 sublane width


def _round_up(x, m):
    return ((x + m - 1) // m) * m


def _critic_kernel(xa_ref, w1_ref, b1_ref, w2_ref, b2_ref, w3_ref, b3_ref,
                   wq_ref, bq_ref, q_ref):
    # Fused linear1 | linear_action (block-diagonal weight) + ReLU.
    # xa is bf16, weights bf16, accumulation f32, biases f32.
    h = jnp.dot(xa_ref[...], w1_ref[...], preferred_element_type=jnp.float32)
    h = jnp.maximum(h + b1_ref[...], 0.0).astype(jnp.bfloat16)          # (TB, 2*Hp)

    # linear2 over the contiguous (state | action) hidden + ReLU.
    h = jnp.dot(h, w2_ref[...], preferred_element_type=jnp.float32)
    h = jnp.maximum(h + b2_ref[...], 0.0).astype(jnp.bfloat16)          # (TB, Hp)

    # linear3 + ReLU (kept in f32: feeds only the VPU head below).
    h = jnp.dot(h, w3_ref[...], preferred_element_type=jnp.float32)
    h = jnp.maximum(h + b3_ref[...], 0.0)                               # (TB, Hp) f32

    # Q head: one output lane -> VPU mul + lane reduction (no 1-wide MXU matmul),
    # stored as a (TB, 1) block so only 4 B/row of Q go back to HBM.
    q_ref[...] = (jnp.sum(h * wq_ref[...].astype(jnp.float32),
                          axis=1, keepdims=True)
                  + bq_ref[...])


def pack_params(params):
    """One-time repack of PyTorch-layout (out, in) weights into kernel layout.

    Weights become bf16 in (in, out) layout with the hidden dim padded to a
    multiple of 128; linear1/linear_action are fused into a block-diagonal
    first-layer weight; biases stay f32 as (1, F) rows.  Padding is exact.
    """
    w1, b1, wa, ba, w2, b2, w3, b3, wq, bq = params
    H, in_dim = w1.shape
    act_dim = wa.shape[1]
    Hp = _round_up(H, LANE)
    F = in_dim + act_dim

    f32 = lambda m: jnp.asarray(m, jnp.float32)

    # Fused first layer: block-diagonal (F, 2*Hp).  Columns [0, Hp) are the state
    # branch, [Hp, 2*Hp) the action branch.
    w1cat = jnp.zeros((F, 2 * Hp), jnp.float32)
    w1cat = w1cat.at[:in_dim, :H].set(f32(w1).T)
    w1cat = w1cat.at[in_dim:, Hp:Hp + H].set(f32(wa).T)
    b1cat = jnp.zeros((1, 2 * Hp), jnp.float32)
    b1cat = b1cat.at[0, :H].set(f32(b1))
    b1cat = b1cat.at[0, Hp:Hp + H].set(f32(ba))

    # linear2: torch weight is (H, 2H) over cat(state_hidden, action_hidden);
    # place its transposed halves onto the padded fused-hidden layout.
    w2t = f32(w2).T                                   # (2H, H)
    w2p = jnp.zeros((2 * Hp, Hp), jnp.float32)
    w2p = w2p.at[:H, :H].set(w2t[:H])
    w2p = w2p.at[Hp:Hp + H, :H].set(w2t[H:])
    b2p = jnp.zeros((1, Hp), jnp.float32).at[0, :H].set(f32(b2))

    w3p = jnp.zeros((Hp, Hp), jnp.float32).at[:H, :H].set(f32(w3).T)
    b3p = jnp.zeros((1, Hp), jnp.float32).at[0, :H].set(f32(b3))

    wqp = jnp.zeros((1, Hp), jnp.float32).at[0, :H].set(f32(wq).reshape(-1))
    bqp = f32(bq).reshape(1, 1)

    bf16 = jnp.bfloat16
    return dict(
        w1=w1cat.astype(bf16), b1=b1cat,
        w2=w2p.astype(bf16), b2=b2p,
        w3=w3p.astype(bf16), b3=b3p,
        wq=wqp.astype(bf16), bq=bqp,
    )


def _vmem_bytes(tb, feat, hp):
    """Conservative VMEM footprint estimate (padded lane/sublane layouts)."""
    lane = lambda n: _round_up(n, LANE)
    sub = lambda n: _round_up(n, SUBLANE)
    weights = 2 * (sub(feat) * 2 * hp + 2 * hp * hp + hp * hp + lane(hp))   # bf16, 1 buffer
    biases = 4 * SUBLANE * (2 * hp + hp + hp + lane(1))                     # f32 rows
    io = 2 * (tb * lane(feat) * 2 + tb * lane(1) * 4)                       # 2x-buffered xa + q tiles
    acts = tb * 4 * hp * (4 + 2)                                            # f32 + bf16 intermediates
    return weights + biases + io + acts


def critic_forward(inputs, actions, packed, *, single_buffer_weights=True):
    """Pallas implementation of Critic_.forward(inputs, actions) -> Q (B, 1)."""
    w1, b1 = packed["w1"], packed["b1"]
    w2, b2 = packed["w2"], packed["b2"]
    w3, b3 = packed["w3"], packed["b3"]
    wq, bq = packed["wq"], packed["bq"]

    F, H2p = w1.shape
    Hp = H2p // 2
    B = inputs.shape[0]

    # Batch tile: aim for >= TARGET_STEPS grid steps (>= 2 per v7x TensorCore) so
    # the BlockSpec pipeline overlaps DMA/compute and the batch axis shards across
    # both TCs.  Multiple of 16 (bf16 sublane packing); cap 1024 (re-sweep for
    # very large B or larger hidden dims).
    TARGET_STEPS = 4
    TB = _round_up((B + TARGET_STEPS - 1) // TARGET_STEPS, 16)
    TB = max(16, min(1024, TB))
    Bp = _round_up(B, TB)

    xa = jnp.concatenate([inputs, actions], axis=1)
    if Bp != B:
        xa = jnp.pad(xa, ((0, Bp - B), (0, 0)))
    xa = xa.astype(jnp.bfloat16)

    batch_map = lambda i: (i, 0)
    const_map = lambda i: (0, 0)

    def resident(shape):
        # Constant index map -> fetched once, held in VMEM across all batch tiles.
        # Buffered(1): no point double-buffering a block whose index never changes.
        if single_buffer_weights:
            try:
                return pl.BlockSpec(shape, const_map, pipeline_mode=pl.Buffered(1))
            except Exception:
                pass  # jax build without pipeline_mode / Buffered(1); use default.
        return pl.BlockSpec(shape, const_map)

    flops = 2 * Bp * (F * 2 * Hp + 2 * Hp * Hp + Hp * Hp + Hp)
    bytes_accessed = (2 * xa.size + 4 * Bp
                      + 2 * (w1.size + w2.size + w3.size + wq.size)
                      + 4 * (b1.size + b2.size + b3.size + bq.size))
    vmem_limit = int(min(32 << 20, max(8 << 20, 2 * _vmem_bytes(TB, F, Hp))))

    q_pad = pl.pallas_call(
        _critic_kernel,
        out_shape=jax.ShapeDtypeStruct((Bp, 1), jnp.float32),
        grid=(Bp // TB,),
        in_specs=[
            pl.BlockSpec((TB, F), batch_map),
            resident((F, 2 * Hp)), resident((1, 2 * Hp)),
            resident((2 * Hp, Hp)), resident((1, Hp)),
            resident((Hp, Hp)), resident((1, Hp)),
            resident((1, Hp)), resident((1, 1)),
        ],
        out_specs=pl.BlockSpec((TB, 1), batch_map),
        compiler_params=pltpu.CompilerParams(
            dimension_semantics=("parallel",),
            vmem_limit_bytes=vmem_limit,
        ),
        cost_estimate=pl.CostEstimate(
            flops=int(flops), transcendentals=0, bytes_accessed=int(bytes_accessed)),
    )(xa, w1, b1, w2, b2, w3, b3, wq, bq)

    return q_pad[:B]


def _reference_forward(inputs, actions, params):
    """Pure-JAX f32 reference matching the PyTorch module."""
    w1, b1, wa, ba, w2, b2, w3, b3, wq, bq = params
    x = jnp.maximum(inputs @ w1.T + b1, 0.0)
    a = jnp.maximum(actions @ wa.T + ba, 0.0)
    h = jnp.concatenate([x, a], axis=1)
    h = jnp.maximum(h @ w2.T + b2, 0.0)
    h = jnp.maximum(h @ w3.T + b3, 0.0)
    return h @ wq.T + bq


def init_params(key, input_dim, action_dim, hidden_dim):
    """Deterministic synthetic init, PyTorch nn.Linear weight layout (out, in)."""
    ks = jax.random.split(key, 10)

    def lin(kw, kb, fan_in, fan_out):
        bound = 1.0 / jnp.sqrt(fan_in)
        w = jax.random.uniform(kw, (fan_out, fan_in), jnp.float32, -bound, bound)
        b = jax.random.uniform(kb, (fan_out,), jnp.float32, -bound, bound)
        return w, b

    w1, b1 = lin(ks[0], ks[1], input_dim, hidden_dim)
    wa, ba = lin(ks[2], ks[3], action_dim, hidden_dim)
    w2, b2 = lin(ks[4], ks[5], 2 * hidden_dim, hidden_dim)
    w3, b3 = lin(ks[6], ks[7], hidden_dim, hidden_dim)
    wq, bq = lin(ks[8], ks[9], hidden_dim, 1)
    return (w1, b1, wa, ba, w2, b2, w3, b3, wq, bq)


if __name__ == "__main__":
    key = jax.random.PRNGKey(0)
    k_in, k_act, k_par = jax.random.split(key, 3)

    batch = 64
    input_dim = 16
    action_dim = 4
    hidden_dim = 32   # exercises the lane-padding path (Hp = 128); grid = (4,)

    inputs = jax.random.normal(k_in, (batch, input_dim), jnp.float32)
    actions = jax.random.normal(k_act, (batch, action_dim), jnp.float32)
    params = init_params(k_par, input_dim, action_dim, hidden_dim)

    # One-time weight repack (off the per-step forward path).
    packed = pack_params(params)
    q_expected = _reference_forward(inputs, actions, params)

    fwd = jax.jit(critic_forward, static_argnames=("single_buffer_weights",))

    def run_and_check(single_buffer):
        q = jax.block_until_ready(
            fwd(inputs, actions, packed, single_buffer_weights=single_buffer))
        assert q.shape == (batch, 1), q.shape
        err = float(jnp.max(jnp.abs(q - q_expected)))
        # bf16 matmul operands with f32 accumulation: loose-but-tight-enough check.
        assert err < 2e-2, err
        return q

    try:
        q = run_and_check(True)
    except Exception:
        # TODO(synk): this jax build rejected pl.Buffered(1) single-buffered
        # resident weights; fall back to default double-buffered weight blocks.
        q = run_and_check(False)

    print("KERNEL_OK")
</pallas_src>

<mosaic_0001>
module attributes {stable_mosaic.version = 11 : i64} {
  func.func @_critic_kernel(%arg0: i32, %arg1: memref<16x20xbf16, #tpu.memory_space<vmem>>, %arg2: memref<20x256xbf16, #tpu.memory_space<vmem>>, %arg3: memref<1x256xf32, #tpu.memory_space<vmem>>, %arg4: memref<256x128xbf16, #tpu.memory_space<vmem>>, %arg5: memref<1x128xf32, #tpu.memory_space<vmem>>, %arg6: memref<128x128xbf16, #tpu.memory_space<vmem>>, %arg7: memref<1x128xf32, #tpu.memory_space<vmem>>, %arg8: memref<1x128xbf16, #tpu.memory_space<vmem>>, %arg9: memref<1x1xf32, #tpu.memory_space<vmem>>, %arg10: memref<16x1xf32, #tpu.memory_space<vmem>>) attributes {dimension_semantics = [#tpu.dimension_semantics<parallel>], iteration_bounds = array<i64: 4>, scalar_prefetch = 0 : i64, scratch_operands = 0 : i64, tpu.core_type = #tpu.core_type<tc>, window_params = [{transform_indices = @transform_0, window_bounds = array<i64: 16, 20>}, {pipeline_mode = #tpu.pipeline_mode<synchronous>, transform_indices = @transform_1, window_bounds = array<i64: 20, 256>}, {pipeline_mode = #tpu.pipeline_mode<synchronous>, transform_indices = @transform_2, window_bounds = array<i64: 1, 256>}, {pipeline_mode = #tpu.pipeline_mode<synchronous>, transform_indices = @transform_3, window_bounds = array<i64: 256, 128>}, {pipeline_mode = #tpu.pipeline_mode<synchronous>, transform_indices = @transform_4, window_bounds = array<i64: 1, 128>}, {pipeline_mode = #tpu.pipeline_mode<synchronous>, transform_indices = @transform_5, window_bounds = array<i64: 128, 128>}, {pipeline_mode = #tpu.pipeline_mode<synchronous>, transform_indices = @transform_6, window_bounds = array<i64: 1, 128>}, {pipeline_mode = #tpu.pipeline_mode<synchronous>, transform_indices = @transform_7, window_bounds = array<i64: 1, 128>}, {pipeline_mode = #tpu.pipeline_mode<synchronous>, transform_indices = @transform_8, window_bounds = array<i64: 1, 1>}, {transform_indices = @transform_9, window_bounds = array<i64: 16, 1>}]} {
    %c0 = arith.constant 0 : index
    %c0_0 = arith.constant 0 : index
    %0 = vector.load %arg1[%c0, %c0_0] : memref<16x20xbf16, #tpu.memory_space<vmem>>, vector<16x20xbf16>
    %c0_1 = arith.constant 0 : index
    %c0_2 = arith.constant 0 : index
    %1 = vector.load %arg2[%c0_1, %c0_2] : memref<20x256xbf16, #tpu.memory_space<vmem>>, vector<20x256xbf16>
    %cst = arith.constant dense<0.000000e+00> : vector<16x256xf32>
    %2 = tpu.matmul %0, %1, %cst {dimension_numbers = #tpu.dot_dimension_numbers<[1], [0], [0], [1], [0, 0, 1, 1], [], []>} : vector<16x20xbf16>, vector<20x256xbf16>, vector<16x256xf32> -> vector<16x256xf32>
    %c0_3 = arith.constant 0 : index
    %c0_4 = arith.constant 0 : index
    %3 = vector.load %arg3[%c0_3, %c0_4] : memref<1x256xf32, #tpu.memory_space<vmem>>, vector<1x256xf32>
    %4 = vector.broadcast %3 : vector<1x256xf32> to vector<16x256xf32>
    %5 = arith.addf %2, %4 : vector<16x256xf32>
    %cst_5 = arith.constant 0.000000e+00 : f32
    %6 = vector.broadcast %cst_5 : f32 to vector<16x256xf32>
    %7 = arith.maximumf %5, %6 : vector<16x256xf32>
    %8 = arith.truncf %7 : vector<16x256xf32> to vector<16x256xbf16>
    %c0_6 = arith.constant 0 : index
    %c0_7 = arith.constant 0 : index
    %9 = vector.load %arg4[%c0_6, %c0_7] : memref<256x128xbf16, #tpu.memory_space<vmem>>, vector<256x128xbf16>
    %cst_8 = arith.constant dense<0.000000e+00> : vector<16x128xf32>
    %10 = tpu.matmul %8, %9, %cst_8 {dimension_numbers = #tpu.dot_dimension_numbers<[1], [0], [0], [1], [0, 0, 1, 1], [], []>} : vector<16x256xbf16>, vector<256x128xbf16>, vector<16x128xf32> -> vector<16x128xf32>
    %c0_9 = arith.constant 0 : index
    %c0_10 = arith.constant 0 : index
    %11 = vector.load %arg5[%c0_9, %c0_10] : memref<1x128xf32, #tpu.memory_space<vmem>>, vector<1x128xf32>
    %12 = vector.broadcast %11 : vector<1x128xf32> to vector<16x128xf32>
    %13 = arith.addf %10, %12 : vector<16x128xf32>
    %cst_11 = arith.constant 0.000000e+00 : f32
    %14 = vector.broadcast %cst_11 : f32 to vector<16x128xf32>
    %15 = arith.maximumf %13, %14 : vector<16x128xf32>
    %16 = arith.truncf %15 : vector<16x128xf32> to vector<16x128xbf16>
    %c0_12 = arith.constant 0 : index
    %c0_13 = arith.constant 0 : index
    %17 = vector.load %arg6[%c0_12, %c0_13] : memref<128x128xbf16, #tpu.memory_space<vmem>>, vector<128x128xbf16>
    %cst_14 = arith.constant dense<0.000000e+00> : vector<16x128xf32>
    %18 = tpu.matmul %16, %17, %cst_14 {dimension_numbers = #tpu.dot_dimension_numbers<[1], [0], [0], [1], [0, 0, 1, 1], [], []>} : vector<16x128xbf16>, vector<128x128xbf16>, vector<16x128xf32> -> vector<16x128xf32>
    %c0_15 = arith.constant 0 : index
    %c0_16 = arith.constant 0 : index
    %19 = vector.load %arg7[%c0_15, %c0_16] : memref<1x128xf32, #tpu.memory_space<vmem>>, vector<1x128xf32>
    %20 = vector.broadcast %19 : vector<1x128xf32> to vector<16x128xf32>
    %21 = arith.addf %18, %20 : vector<16x128xf32>
    %cst_17 = arith.constant 0.000000e+00 : f32
    %22 = vector.broadcast %cst_17 : f32 to vector<16x128xf32>
    %23 = arith.maximumf %21, %22 : vector<16x128xf32>
    %c0_18 = arith.constant 0 : index
    %c0_19 = arith.constant 0 : index
    %24 = vector.load %arg8[%c0_18, %c0_19] : memref<1x128xbf16, #tpu.memory_space<vmem>>, vector<1x128xbf16>
    %25 = arith.extf %24 : vector<1x128xbf16> to vector<1x128xf32>
    %26 = vector.broadcast %25 : vector<1x128xf32> to vector<16x128xf32>
    %27 = arith.mulf %23, %26 : vector<16x128xf32>
    %cst_20 = arith.constant dense<0.000000e+00> : vector<16xf32>
    %28 = vector.multi_reduction <add>, %27, %cst_20 [1] : vector<16x128xf32> to vector<16xf32>
    %29 = vector.shape_cast %28 : vector<16xf32> to vector<16x1xf32>
    %c0_21 = arith.constant 0 : index
    %c0_22 = arith.constant 0 : index
    %30 = vector.load %arg9[%c0_21, %c0_22] : memref<1x1xf32, #tpu.memory_space<vmem>>, vector<1x1xf32>
    %31 = vector.broadcast %30 : vector<1x1xf32> to vector<16x1xf32>
    %32 = arith.addf %29, %31 : vector<16x1xf32>
    %c0_23 = arith.constant 0 : index
    %c0_24 = arith.constant 0 : index
    %33 = vector.load %arg10[%c0_23, %c0_24] : memref<16x1xf32, #tpu.memory_space<vmem>>, vector<16x1xf32>
    tpu.vector_store %arg10[%c0_23, %c0_24], %32 {strides = array<i32>} : memref<16x1xf32, #tpu.memory_space<vmem>>, vector<16x1xf32>,
    return
  }
  func.func @transform_0(%arg0: i32) -> (i32, i32) {
    %c0_i32 = arith.constant 0 : i32
    %c0_i32_0 = arith.constant 0 : i32
    return %arg0, %c0_i32 : i32, i32
  }
  func.func @transform_1(%arg0: i32) -> (i32, i32) {
    %c0_i32 = arith.constant 0 : i32
    %c0_i32_0 = arith.constant 0 : i32
    %c0_i32_1 = arith.constant 0 : i32
    return %c0_i32, %c0_i32_0 : i32, i32
  }
  func.func @transform_2(%arg0: i32) -> (i32, i32) {
    %c0_i32 = arith.constant 0 : i32
    %c0_i32_0 = arith.constant 0 : i32
    %c0_i32_1 = arith.constant 0 : i32
    return %c0_i32, %c0_i32_0 : i32, i32
  }
  func.func @transform_3(%arg0: i32) -> (i32, i32) {
    %c0_i32 = arith.constant 0 : i32
    %c0_i32_0 = arith.constant 0 : i32
    %c0_i32_1 = arith.constant 0 : i32
    return %c0_i32, %c0_i32_0 : i32, i32
  }
  func.func @transform_4(%arg0: i32) -> (i32, i32) {
    %c0_i32 = arith.constant 0 : i32
    %c0_i32_0 = arith.constant 0 : i32
    %c0_i32_1 = arith.constant 0 : i32
    return %c0_i32, %c0_i32_0 : i32, i32
  }
  func.func @transform_5(%arg0: i32) -> (i32, i32) {
    %c0_i32 = arith.constant 0 : i32
    %c0_i32_0 = arith.constant 0 : i32
    %c0_i32_1 = arith.constant 0 : i32
    return %c0_i32, %c0_i32_0 : i32, i32
  }
  func.func @transform_6(%arg0: i32) -> (i32, i32) {
    %c0_i32 = arith.constant 0 : i32
    %c0_i32_0 = arith.constant 0 : i32
    %c0_i32_1 = arith.constant 0 : i32
    return %c0_i32, %c0_i32_0 : i32, i32
  }
  func.func @transform_7(%arg0: i32) -> (i32, i32) {
    %c0_i32 = arith.constant 0 : i32
    %c0_i32_0 = arith.constant 0 : i32
    %c0_i32_1 = arith.constant 0 : i32
    return %c0_i32, %c0_i32_0 : i32, i32
  }
  func.func @transform_8(%arg0: i32) -> (i32, i32) {
    %c0_i32 = arith.constant 0 : i32
    %c0_i32_0 = arith.constant 0 : i32
    %c0_i32_1 = arith.constant 0 : i32
    return %c0_i32, %c0_i32_0 : i32, i32
  }
  func.func @transform_9(%arg0: i32) -> (i32, i32) {
    %c0_i32 = arith.constant 0 : i32
    %c0_i32_0 = arith.constant 0 : i32
    return %arg0, %c0_i32 : i32, i32
  }
}

module attributes {stable_mosaic.version = 11 : i64} {
  func.func @_critic_kernel(%arg0: i32, %arg1: memref<16x20xbf16, #tpu.memory_space<vmem>>, %arg2: memref<20x256xbf16, #tpu.memory_space<vmem>>, %arg3: memref<1x256xf32, #tpu.memory_space<vmem>>, %arg4: memref<256x128xbf16, #tpu.memory_space<vmem>>, %arg5: memref<1x128xf32, #tpu.memory_space<vmem>>, %arg6: memref<128x128xbf16, #tpu.memory_space<vmem>>, %arg7: memref<1x128xf32, #tpu.memory_space<vmem>>, %arg8: memref<1x128xbf16, #tpu.memory_space<vmem>>, %arg9: memref<1x1xf32, #tpu.memory_space<vmem>>, %arg10: memref<16x1xf32, #tpu.memory_space<vmem>>) attributes {dimension_semantics = [#tpu.dimension_semantics<parallel>], iteration_bounds = array<i64: 4>, scalar_prefetch = 0 : i64, scratch_operands = 0 : i64, tpu.core_type = #tpu.core_type<tc>, window_params = [{transform_indices = @transform_0, window_bounds = array<i64: 16, 20>}, {pipeline_mode = #tpu.pipeline_mode<synchronous>, transform_indices = @transform_1, window_bounds = array<i64: 20, 256>}, {pipeline_mode = #tpu.pipeline_mode<synchronous>, transform_indices = @transform_2, window_bounds = array<i64: 1, 256>}, {pipeline_mode = #tpu.pipeline_mode<synchronous>, transform_indices = @transform_3, window_bounds = array<i64: 256, 128>}, {pipeline_mode = #tpu.pipeline_mode<synchronous>, transform_indices = @transform_4, window_bounds = array<i64: 1, 128>}, {pipeline_mode = #tpu.pipeline_mode<synchronous>, transform_indices = @transform_5, window_bounds = array<i64: 128, 128>}, {pipeline_mode = #tpu.pipeline_mode<synchronous>, transform_indices = @transform_6, window_bounds = array<i64: 1, 128>}, {pipeline_mode = #tpu.pipeline_mode<synchronous>, transform_indices = @transform_7, window_bounds = array<i64: 1, 128>}, {pipeline_mode = #tpu.pipeline_mode<synchronous>, transform_indices = @transform_8, window_bounds = array<i64: 1, 1>}, {transform_indices = @transform_9, window_bounds = array<i64: 16, 1>}]} {
    %c0 = arith.constant 0 : index
    %c0_0 = arith.constant 0 : index
    %0 = vector.load %arg1[%c0, %c0_0] : memref<16x20xbf16, #tpu.memory_space<vmem>>, vector<16x20xbf16>
    %c0_1 = arith.constant 0 : index
    %c0_2 = arith.constant 0 : index
    %1 = vector.load %arg2[%c0_1, %c0_2] : memref<20x256xbf16, #tpu.memory_space<vmem>>, vector<20x256xbf16>
    %cst = arith.constant dense<0.000000e+00> : vector<16x256xf32>
    %2 = tpu.matmul %0, %1, %cst {dimension_numbers = #tpu.dot_dimension_numbers<[1], [0], [0], [1], [0, 0, 1, 1], [], []>} : vector<16x20xbf16>, vector<20x256xbf16>, vector<16x256xf32> -> vector<16x256xf32>
    %c0_3 = arith.constant 0 : index
    %c0_4 = arith.constant 0 : index
    %3 = vector.load %arg3[%c0_3, %c0_4] : memref<1x256xf32, #tpu.memory_space<vmem>>, vector<1x256xf32>
    %4 = vector.broadcast %3 : vector<1x256xf32> to vector<16x256xf32>
    %5 = arith.addf %2, %4 : vector<16x256xf32>
    %cst_5 = arith.constant 0.000000e+00 : f32
    %6 = vector.broadcast %cst_5 : f32 to vector<16x256xf32>
    %7 = arith.maximumf %5, %6 : vector<16x256xf32>
    %8 = arith.truncf %7 : vector<16x256xf32> to vector<16x256xbf16>
    %c0_6 = arith.constant 0 : index
    %c0_7 = arith.constant 0 : index
    %9 = vector.load %arg4[%c0_6, %c0_7] : memref<256x128xbf16, #tpu.memory_space<vmem>>, vector<256x128xbf16>
    %cst_8 = arith.constant dense<0.000000e+00> : vector<16x128xf32>
    %10 = tpu.matmul %8, %9, %cst_8 {dimension_numbers = #tpu.dot_dimension_numbers<[1], [0], [0], [1], [0, 0, 1, 1], [], []>} : vector<16x256xbf16>, vector<256x128xbf16>, vector<16x128xf32> -> vector<16x128xf32>
    %c0_9 = arith.constant 0 : index
    %c0_10 = arith.constant 0 : index
    %11 = vector.load %arg5[%c0_9, %c0_10] : memref<1x128xf32, #tpu.memory_space<vmem>>, vector<1x128xf32>
    %12 = vector.broadcast %11 : vector<1x128xf32> to vector<16x128xf32>
    %13 = arith.addf %10, %12 : vector<16x128xf32>
    %cst_11 = arith.constant 0.000000e+00 : f32
    %14 = vector.broadcast %cst_11 : f32 to vector<16x128xf32>
    %15 = arith.maximumf %13, %14 : vector<16x128xf32>
    %16 = arith.truncf %15 : vector<16x128xf32> to vector<16x128xbf16>
    %c0_12 = arith.constant 0 : index
    %c0_13 = arith.constant 0 : index
    %17 = vector.load %arg6[%c0_12, %c0_13] : memref<128x128xbf16, #tpu.memory_space<vmem>>, vector<128x128xbf16>
    %cst_14 = arith.constant dense<0.000000e+00> : vector<16x128xf32>
    %18 = tpu.matmul %16, %17, %cst_14 {dimension_numbers = #tpu.dot_dimension_numbers<[1], [0], [0], [1], [0, 0, 1, 1], [], []>} : vector<16x128xbf16>, vector<128x128xbf16>, vector<16x128xf32> -> vector<16x128xf32>
    %c0_15 = arith.constant 0 : index
    %c0_16 = arith.constant 0 : index
    %19 = vector.load %arg7[%c0_15, %c0_16] : memref<1x128xf32, #tpu.memory_space<vmem>>, vector<1x128xf32>
    %20 = vector.broadcast %19 : vector<1x128xf32> to vector<16x128xf32>
    %21 = arith.addf %18, %20 : vector<16x128xf32>
    %cst_17 = arith.constant 0.000000e+00 : f32
    %22 = vector.broadcast %cst_17 : f32 to vector<16x128xf32>
    %23 = arith.maximumf %21, %22 : vector<16x128xf32>
    %c0_18 = arith.constant 0 : index
    %c0_19 = arith.constant 0 : index
    %24 = vector.load %arg8[%c0_18, %c0_19] : memref<1x128xbf16, #tpu.memory_space<vmem>>, vector<1x128xbf16>
    %25 = arith.extf %24 : vector<1x128xbf16> to vector<1x128xf32>
    %26 = vector.broadcast %25 : vector<1x128xf32> to vector<16x128xf32>
    %27 = arith.mulf %23, %26 : vector<16x128xf32>
    %cst_20 = arith.constant dense<0.000000e+00> : vector<16xf32>
    %28 = vector.multi_reduction <add>, %27, %cst_20 [1] : vector<16x128xf32> to vector<16xf32>
    %29 = vector.shape_cast %28 : vector<16xf32> to vector<16x1xf32>
    %c0_21 = arith.constant 0 : index
    %c0_22 = arith.constant 0 : index
    %30 = vector.load %arg9[%c0_21, %c0_22] : memref<1x1xf32, #tpu.memory_space<vmem>>, vector<1x1xf32>
    %31 = vector.broadcast %30 : vector<1x1xf32> to vector<16x1xf32>
    %32 = arith.addf %29, %31 : vector<16x1xf32>
    %c0_23 = arith.constant 0 : index
    %c0_24 = arith.constant 0 : index
    %33 = vector.load %arg10[%c0_23, %c0_24] : memref<16x1xf32, #tpu.memory_space<vmem>>, vector<16x1xf32>
    tpu.vector_store %arg10[%c0_23, %c0_24], %32 {strides = array<i32>} : memref<16x1xf32, #tpu.memory_space<vmem>>, vector<16x1xf32>,
    return
  }
  func.func @transform_0(%arg0: i32) -> (i32, i32) {
    %c0_i32 = arith.constant 0 : i32
    %c0_i32_0 = arith.constant 0 : i32
    return %arg0, %c0_i32 : i32, i32
  }
  func.func @transform_1(%arg0: i32) -> (i32, i32) {
    %c0_i32 = arith.constant 0 : i32
    %c0_i32_0 = arith.constant 0 : i32
    %c0_i32_1 = arith.constant 0 : i32
    return %c0_i32, %c0_i32_0 : i32, i32
  }
  func.func @transform_2(%arg0: i32) -> (i32, i32) {
    %c0_i32 = arith.constant 0 : i32
    %c0_i32_0 = arith.constant 0 : i32
    %c0_i32_1 = arith.constant 0 : i32
    return %c0_i32, %c0_i32_0 : i32, i32
  }
  func.func @transform_3(%arg0: i32) -> (i32, i32) {
    %c0_i32 = arith.constant 0 : i32
    %c0_i32_0 = arith.constant 0 : i32
    %c0_i32_1 = arith.constant 0 : i32
    return %c0_i32, %c0_i32_0 : i32, i32
  }
  func.func @transform_4(%arg0: i32) -> (i32, i32) {
    %c0_i32 = arith.constant 0 : i32
    %c0_i32_0 = arith.constant 0 : i32
    %c0_i32_1 = arith.constant 0 : i32
    return %c0_i32, %c0_i32_0 : i32, i32
  }
  func.func @transform_5(%arg0: i32) -> (i32, i32) {
    %c0_i32 = arith.constant 0 : i32
    %c0_i32_0 = arith.constant 0 : i32
    %c0_i32_1 = arith.constant 0 : i32
    return %c0_i32, %c0_i32_0 : i32, i32
  }
  func.func @transform_6(%arg0: i32) -> (i32, i32) {
    %c0_i32 = arith.constant 0 : i32
    %c0_i32_0 = arith.constant 0 : i32
    %c0_i32_1 = arith.constant 0 : i32
    return %c0_i32, %c0_i32_0 : i32, i32
  }
  func.func @transform_7(%arg0: i32) -> (i32, i32) {
    %c0_i32 = arith.constant 0 : i32
    %c0_i32_0 = arith.constant 0 : i32
    %c0_i32_1 = arith.constant 0 : i32
    return %c0_i32, %c0_i32_0 : i32, i32
  }
  func.func @transform_8(%arg0: i32) -> (i32, i32) {
    %c0_i32 = arith.constant 0 : i32
    %c0_i32_0 = arith.constant 0 : i32
    %c0_i32_1 = arith.constant 0 : i32
    return %c0_i32, %c0_i32_0 : i32, i32
  }
  func.func @transform_9(%arg0: i32) -> (i32, i32) {
    %c0_i32 = arith.constant 0 : i32
    %c0_i32_0 = arith.constant 0 : i32
    return %arg0, %c0_i32 : i32, i32
  }
}

</mosaic_0001>

<bundles_post_ra>
// kernel: critic_forward.1
= control target key start
LH: loop header
LB: loop body
LE: loop exit
PB: predicated region body
PF: predicated region fallthrough
CT: control target
= control target key end

     0   :  { %s1195_s0 = inlined_call_operand.vmem [shape: bf16[64,20], index: 0, kind: input, shape index: {}]   ;;  %s1196_s1 = inlined_call_operand.vmem [shape: bf16[20,256], index: 1, kind: input, shape index: {}]   ;;  %s1197_s2 = inlined_call_operand.vmem [shape: f32[1,256], index: 2, kind: input, shape index: {}]   ;;  %s1198_s3 = inlined_call_operand.hbm [shape: bf16[256,128], index: 3, kind: input, shape index: {}]   ;;  %s1199_s4 = inlined_call_operand.vmem [shape: f32[1,128], index: 4, kind: input, shape index: {}]   ;;  %s1200_s5 = inlined_call_operand.vmem [shape: bf16[128,128], index: 5, kind: input, shape index: {}]   ;;  %s1201_s6 = inlined_call_operand.vmem [shape: f32[1,128], index: 6, kind: input, shape index: {}]   ;;  %s1202_s7 = inlined_call_operand.vmem [shape: bf16[1,128], index: 7, kind: input, shape index: {}]   ;;  %s1203_s8 = inlined_call_operand.<no memory space> [shape: f32[1,1], index: 8, kind: input, shape index: {}]   ;;  %s1204_s9 = inlined_call_operand.vmem [shape: f32[64,1], index: 9, kind: output, shape index: {}]  }
   0x1   :  { %v14_v0 = vstv %s1203_s8 }
   0x2   :  { %15 = vst [vmem:[#allocation2] sm:$0x1] %v14_v0 }
   0x3   :  { %16 = vsyncpa [#allocation4], 0  ;;  %s1087_s11 = smov 0  }
   0x4 LB: > { %s836_s12 = sadd.s32 4294967295, %s1026_s11   ;;  %p838_p0 = scmp.ge.s32.totalorder %s1026_s11, 1  ;;  %s1026_s11 = sphi %s1087_s11, %s22_s11  }
   0x5   : > { %p247_p1 = scmp.lt.s32.totalorder %s1026_s11, 5  ;;  %s1028_s13 = smov [#allocation3]  }
   0x6   : > { %s265_s14 = sshll.u32 %s1028_s13, 4  ;;  %p1101_p3 = scmp.eq.s32.totalorder %s836_s12, 0  ;;  %s266_s14 = int_to_ptr.vmem [resolvable:$true] %s265_s14 }
   0x7   : > { %p1095_p2 = pnand %p838_p0, %p247_p1  ;;  %s988_s19 = scalar_lea.hbm %s1198_s3, 2048 }
   0x8   : > { %s1209_s15 = scalar_select %p1101_p3, 1, 0 }
   0x9   : > { %s1208_s8 = scalar_select %p1095_p2, 1, 0 }
   0xa   : > { %p938_p4 = pneg %p1095_p2  ;;  %p989_p6 = scmp.ne.s32.totalorder %s1198_s3, %s988_s19 }
   0xb   : > { %p995_p10 = scmp.lt.u32.totalorder %s988_s19, %s1198_s3 }
   0xc   : > { %p1109_p5 = pnand %p1101_p3, %p938_p4 }
   0xe   : > { %p990_p7 = pneg %p1109_p5 }
  0x10   : > { %p991_p8 = pnand %p990_p7, %p989_p6 }
  0x12   : > { %p992_p9 = pneg %p991_p8 }
  0x14   : > { %p997_p11 = pnand %p995_p10, %p992_p9 }
  0x16   : > { %1000 = shalt.err (!%p997_p11)
}
  0x17   : > { %s1001_s24 = scalar_lea.vmem %s266_s14, 2048  ;;  %p1009_p1 = scmp.lt.s32.totalorder %s266_s14, %s266_s14 }
  0x18   : > { %p1002_p12 = scmp.ne.s32.totalorder %s266_s14, %s1001_s24  ;;  %p1010_p4 = scmp.lt.s32.totalorder %s1001_s24, %s1001_s24 }
  0x1a   : > { %p1004_p13 = pnand %p1002_p12, %p990_p7  ;;  %p1011_p3 = por %p1010_p4, %p1009_p1 }
  0x1c   : > { %p1005_p0 = pneg %p1004_p13 }
  0x1e   : > { %p1012_p2 = pnand %p1011_p3, %p1005_p0 }
  0x20   : > { %1015 = shalt.err (!%p1012_p2)
}
  0x21   : > { %s1029_s25 = smov 64   ;;  %s1030_s26 = smov 4  }
  0x22   : > { %941 = dma.hbm_to_vmem [thread:$0]  (!%p1109_p5), %s1198_s3, 2048, %s266_s14, [#allocation4], %s1029_s25, %s1029_s25, %s1030_s26  }
  0x23   : > { %p1211_p6 = scmp.ne.s32.totalorder %s1208_s8, 0 }
  0x24   : > { %p1212_p8 = scmp.ne.s32.totalorder (!%p1211_p6), %s1209_s15, 0 }
  0x25   : > { %305 = sbr.rel (%p1211_p6) target bundleno = 866 (0x362), region = 56 }
  0x2c   : > { %1021 = dma.done.wait (%p1212_p8), [#allocation4], 2048  }
  0x2d   : > { %1023 = vsyncadd (%p1212_p8), [#allocation4], 4294965248  ;;  %s843_s29 = sshll.u32 %s836_s12, 1  ;;  %v1031_v1 = vmov 0   ;;  %v958_v2 = vld [vmem:[%s1196_s1 + $0x4] ss:$8 sps:$4 sm:$0xff]   ;;  %v361_v31 = vlaneseq }
  0x2e   : > { %434 = vmatprep.mubr.bf16.mxu0 %v1031_v1  ;;  %p342_p2 = scmp.lt.s32.totalorder %s843_s29, 7  ;;  %vm395_vm0 = vcmask 1041408   ;;  %v960_v3 = vld [vmem:[%s1196_s1] ss:$8 sps:$4 sm:$0xff]   ;;  %v358_v4 = vld [vmem:[%s1196_s1 + $0x10] sm:$0x33]  ;;  %402 = vmatprep.subr.bf16.mxu0 %v958_v2 }
  0x2f   : > { %v851_v5 = vcombine.high %v358_v4, %v358_v4  ;;  %v850_v6 = vcombine.low %v358_v4, %v358_v4  ;;  %403 = vmatpush1.bf16.msra.mxu0 %v960_v3  ;;  %v964_v7 = vld [vmem:[#allocation3 + $0x40] sm:$0xff]   ;;  %v966_v11 = vld [vmem:[#allocation3 + $0x48] sm:$0xff]   ;;  %vm391_vm1 = vcmask 162816   ;;  %v968_v13 = vld [vmem:[#allocation3 + $0x50] sm:$0xff]   ;;  %v1032_v26 = vmov 0.0  }
  0x30   : > { %s1214_s29 = smov (!%p342_p2, %s843_s29), 7  ;;  %v965_v10 = vld [vmem:[#allocation3] sm:$0xff]   ;;  %883 = vmatprep.subr.bf16.mxu1 %v964_v7  ;;  %v967_v12 = vld [vmem:[#allocation3 + $0x8] sm:$0xff]   ;;  %v969_v14 = vld [vmem:[#allocation3 + $0x10] sm:$0xff]   ;;  %v362_v32 = vshrl.u32 %v361_v31, 7  ;;  %vm1033_vm2 = vmmov 0  }
  0x31   : > { %s844_s30 = sshll.u32 %s1214_s29, 2  ;;  %852 = vmatprep.subr.msk.bf16.mxu0 %vm395_vm0, %v851_v5  ;;  %v397_v8 = vsel %vm395_vm0, %v850_v6, 0  ;;  %884 = vmatpush3.bf16.msra.mxu1 %v965_v10  ;;  %v970_v15 = vld [vmem:[#allocation3 + $0x58] sm:$0xff]   ;;  %v972_v17 = vld [vmem:[#allocation3 + $0x60] sm:$0xff]   ;;  %v974_v19 = vld [vmem:[#allocation3 + $0x68] sm:$0xff]   ;;  %s846_s23 = sshll.u32 %s1214_s29, 3 }
  0x32   : > { %s345_s15 = scalar_lea.vmem %s1195_s0, %s844_s30  ;;  %885 = vmatprep.subr.bf16.mxu1 %v966_v11  ;;  %v971_v16 = vld [vmem:[#allocation3 + $0x18] sm:$0xff]   ;;  %v973_v18 = vld [vmem:[#allocation3 + $0x20] sm:$0xff]   ;;  %v975_v20 = vld [vmem:[#allocation3 + $0x28] sm:$0xff]   ;;  %v363_v33 = vsub.s32 0, %v362_v32  ;;  %v367_v35 = vsub.s32 1, %v362_v32  ;;  %s351_s26 = scalar_lea.vmem %s1204_s9, %s846_s23  ;;  %vm765_vm3 = vcmask 7168  }
  0x33   : > { %v963_v9 = vld [vmem:[%s345_s15] sm:$0xff]   ;;  %405 = vmatpush1.bf16.msra.mxu0 %v397_v8  ;;  %v976_v21 = vld [vmem:[#allocation3 + $0x70] sm:$0xff]   ;;  %v981_v27 = vld [vmem:[%s1200_s5 + $0x8] sm:$0xff]  }
  0x34   : > { %v977_v22 = vld [vmem:[#allocation3 + $0x30] sm:$0xff]   ;;  %v978_v23 = vld [vmem:[#allocation3 + $0x78] sm:$0xff]   ;;  %914 = vmatprep.subr.bf16.mxu0 %v1032_v26  ;;  %v985_v52 = vld [vmem:[%s1200_s5 + $0x28] sm:$0xff]  }
  0x35   : > { %886 = vmatpush3.bf16.msra.mxu1 %v967_v12  ;;  %v979_v24 = vld [vmem:[#allocation3 + $0x38] sm:$0xff]   ;;  %v982_v28 = vld [vmem:[%s1200_s5 + $0x10] sm:$0xff]  }
  0x36   : > { %853 = vmatmul.mubr.msk.bf16.vlgmr.msra.gmra.mrb[0].mxu0 %vm391_vm1, %v963_v9  ;;  %887 = vmatprep.subr.bf16.mxu1 %v968_v13  ;;  %v980_v25 = vld [vmem:[%s1200_s5] sm:$0xff]   ;;  %v983_v29 = vld [vmem:[%s1200_s5 + $0x18] sm:$0xff]   ;;  %v986_v53 = vld [vmem:[%s1200_s5 + $0x30] sm:$0xff]  }
  0x37   : > { %915 = vmatpush3.bf16.msra.mxu0 %v980_v25  ;;  %v984_v30 = vld [vmem:[%s1200_s5 + $0x20] sm:$0xff]   ;;  %v987_v54 = vld [vmem:[%s1200_s5 + $0x38] sm:$0xff]   ;;  %930 = vmatprep.mubr.msk.bf16.mxu0 %vm1033_vm2, %v1032_v26 }
  0x38   : > { %916 = vmatprep.subr.bf16.mxu0 %v1032_v26  ;;  %v359_v34 = vld [vmem:[%s1197_s2] sm:$0x3] }
  0x39   : > { %888 = vmatpush3.bf16.msra.mxu1 %v969_v14  ;;  %v364_v36 = vrot.slane %v359_v34, %v363_v33  ;;  %v368_v37 = vrot.slane %v359_v34, %v367_v35  ;;  %v854_v56 = vld [vmem:[%s1199_s4] ss:$0 sm:$0xff] }
  0x3a   : > { %889 = vmatprep.subr.bf16.mxu1 %v970_v15  ;;  %v744_v3 = vld [vmem:[%s1202_s7] sm:$0x1] }
  0x3b   : > { %917 = vmatpush3.bf16.msra.mxu0 %v981_v27  ;;  %v745_v4 = vunpack.c.l.bf16 %v744_v3  ;;  %v871_v5 = vld [vmem:[%s1201_s6] ss:$0 sm:$0xff] }
  0x3c   : > { %918 = vmatprep.subr.bf16.mxu0 %v1032_v26 }
  0x3d   : > { %890 = vmatpush3.bf16.msra.mxu1 %v971_v16  ;;  %v749_v9 = vrot.slane %v745_v4, %v363_v33 }
  0x3e   : > { %891 = vmatprep.subr.bf16.mxu1 %v972_v17  ;;  %v880_v17 = vld [vmem:[#allocation2] ss:$0 sm:$0xff] }
  0x3f   : > { %919 = vmatpush3.bf16.msra.mxu0 %v982_v28 }
  0x40   : > { %920 = vmatprep.subr.bf16.mxu0 %v1032_v26 }
  0x41   : > { %892 = vmatpush3.bf16.msra.mxu1 %v973_v18 }
  0x42   : > { %893 = vmatprep.subr.bf16.mxu1 %v974_v19 }
  0x43   : > { %921 = vmatpush3.bf16.msra.mxu0 %v983_v29 }
  0x44   : > { %922 = vmatprep.subr.bf16.mxu0 %v1032_v26 }
  0x45   : > { %894 = vmatpush3.bf16.msra.mxu1 %v975_v20 }
  0x46   : > { %895 = vmatprep.subr.bf16.mxu1 %v976_v21 }
  0x47   : > { %923 = vmatpush3.bf16.msra.mxu0 %v984_v30 }
  0x48   : > { %924 = vmatprep.subr.bf16.mxu0 %v1032_v26 }
  0x49   : > { %896 = vmatpush3.bf16.msra.mxu1 %v977_v22 }
  0x4a   : > { %897 = vmatprep.subr.bf16.mxu1 %v978_v23 }
  0x4b   : > { %925 = vmatpush3.bf16.msra.mxu0 %v985_v52 }
  0x4c   : > { %926 = vmatprep.subr.bf16.mxu0 %v1032_v26 }
  0x4d   : > { %898 = vmatpush3.bf16.msra.mxu1 %v979_v24 }
  0x4f   : > { %927 = vmatpush3.bf16.msra.mxu0 %v986_v53 }
  0x50   : > { %928 = vmatprep.subr.bf16.mxu0 %v1032_v26 }
  0x53   : > { %929 = vmatpush3.bf16.msra.mxu0 %v987_v54 }
 0x109   : > { %v436_v38 = vpop.f32.mrb[0].mxu0 }
 0x10a   : > { %v437_v39 = vadd.f32 %v436_v38, %v364_v36  ;;  %v438_v40 = vpop.f32.mrb[1].mxu0 }
 0x10b   : > { %v439_v41 = vadd.f32 %v438_v40, %v368_v37  ;;  %v440_v42 = vpop.f32.mrb[2].mxu0 }
 0x10c   : > { %v441_v43 = vadd.f32 %v440_v42, %v364_v36  ;;  %v442_v44 = vpop.f32.mrb[3].mxu0  ;;  %v445_v46 = vmax.f32 %v437_v39, 0.0 }
 0x10d   : > { %v443_v45 = vadd.f32 %v442_v44, %v368_v37  ;;  %v446_v48 = vmax.f32 %v439_v41, 0.0 }
 0x10e   : > { %v447_v47 = vmax.f32 %v441_v43, 0.0 }
 0x10f   : > { %v448_v49 = vmax.f32 %v443_v45, 0.0 }
 0x110   : > { %v449_v50 = vpack.c.bf16 %v447_v47, %v445_v46 }
 0x111   : > { %v450_v51 = vpack.c.bf16 %v448_v49, %v446_v48 }
 0x113   : > { %618 = vmatprep.mubr.bf16.mxu1 %v450_v51 }
 0x114   : > { %619 = vmatmul.mubr.bf16.vlgmr.msra.gmra.mrb[0].mxu1 %v449_v50 }
 0x1e7   : > { %v899_v55 = vpop.f32.mrb[0].mxu1 }
 0x1e8   : > { %v900_v57 = vpop.f32.mrb[1].mxu1 }
 0x1e9   : > { %v901_v58 = vadd.f32 %v900_v57, %v899_v55  ;;  %v902_v59 = vpop.f32.mrb[2].mxu1 }
 0x1ea   : > { %v903_v60 = vpop.f32.mrb[3].mxu1 }
 0x1eb   : > { %v621_v61 = vadd.f32 %v901_v58, %v854_v56  ;;  %v904_v62 = vadd.f32 %v903_v60, %v902_v59 }
 0x1ed   : > { %v624_v63 = vadd.f32 %v904_v62, %v854_v56  ;;  %v627_v0 = vmax.f32 %v621_v61, 0.0 }
 0x1ef   : > { %v628_v1 = vmax.f32 %v624_v63, 0.0 }
 0x1f1   : > { %v629_v2 = vpack.c.bf16 %v628_v1, %v627_v0 }
 0x1f3   : > { %931 = vmatmul.mubr.bf16.vlgmr.msra.gmra.mrb[4].mxu0 %v629_v2 }
 0x2c6   : > { %v735_v6 = vpop.f32.mrb[4].mxu0 }
 0x2c7   : > { %v736_v7 = vadd.f32 %v871_v5, %v735_v6  ;;  %v932_v8 = vpop.f32.mrb[5].mxu0 }
 0x2c8   : > { %v738_v10 = vpop.f32.mrb[6].mxu0 }
 0x2c9   : > { %v742_v11 = vmax.f32 %v736_v7, 0.0  ;;  %v739_v12 = vadd.f32 %v871_v5, %v738_v10  ;;  %v933_v13 = vpop.f32.mrb[7].mxu0 }
 0x2cb   : > { %v743_v14 = vmax.f32 %v739_v12, 0.0  ;;  %v750_v15 = vmul.f32 %v749_v9, %v742_v11 }
 0x2cd   : > { %752 = vadd.xlane.f32.xlu0 %v750_v15  ;;  %v751_v16 = vmul.f32 %v749_v9, %v743_v14 }
 0x2d1   : > { %754 = vadd.xlane.f32.xlu0 %v751_v16 }
 0x35a   : > { %v753_v18 = vpop.xlane.xlu0 %752 }
 0x35b   : > { %v763_v19 = vadd.f32 %v880_v17, %v753_v18 }
 0x35d   : > { %766 = vst.msk [vmem:[%s351_s26] sm:$0xff] %vm765_vm3, %v763_v19 }
 0x35e   : > { %v755_v20 = vpop.xlane.xlu0 %754 }
 0x35f   : > { %v764_v21 = vadd.f32 %v880_v17, %v755_v20 }
 0x361   : > { %767 = vst.msk [vmem:[%s351_s26 + $0x8] sm:$0xff] %vm765_vm3, %v764_v21 }
 0x362 PF: > { %s22_s11 = sadd.s32 1, %s1026_s11  }
 0x363   : > { %p19_p3 = scmp.ge.s32.totalorder %s22_s11, 6  }
 0x365   :  { %21 = sbr.rel (!%p19_p3) target bundleno = 4 (0x4), region = 91 }
 0x36c   :  { %790 = vsyncpa [#allocation4], 1 }
 0x36d   :  { %792 = vsyncpa [#allocation4 + $0x1], 1 }

// kernel: critic_forward.1
= control target key start
LH: loop header
LB: loop body
LE: loop exit
PB: predicated region body
PF: predicated region fallthrough
CT: control target
= control target key end

     0   :  { %s1195_s0 = inlined_call_operand.vmem [shape: bf16[64,20], index: 0, kind: input, shape index: {}]   ;;  %s1196_s1 = inlined_call_operand.vmem [shape: bf16[20,256], index: 1, kind: input, shape index: {}]   ;;  %s1197_s2 = inlined_call_operand.vmem [shape: f32[1,256], index: 2, kind: input, shape index: {}]   ;;  %s1198_s3 = inlined_call_operand.hbm [shape: bf16[256,128], index: 3, kind: input, shape index: {}]   ;;  %s1199_s4 = inlined_call_operand.vmem [shape: f32[1,128], index: 4, kind: input, shape index: {}]   ;;  %s1200_s5 = inlined_call_operand.vmem [shape: bf16[128,128], index: 5, kind: input, shape index: {}]   ;;  %s1201_s6 = inlined_call_operand.vmem [shape: f32[1,128], index: 6, kind: input, shape index: {}]   ;;  %s1202_s7 = inlined_call_operand.vmem [shape: bf16[1,128], index: 7, kind: input, shape index: {}]   ;;  %s1203_s8 = inlined_call_operand.<no memory space> [shape: f32[1,1], index: 8, kind: input, shape index: {}]   ;;  %s1204_s9 = inlined_call_operand.vmem [shape: f32[64,1], index: 9, kind: output, shape index: {}]  }
   0x1   :  { %v14_v0 = vstv %s1203_s8 }
   0x2   :  { %15 = vst [vmem:[#allocation2] sm:$0x1] %v14_v0 }
   0x3   :  { %16 = vsyncpa [#allocation4], 0  ;;  %s1087_s11 = smov 0  }
   0x4 LB: > { %s836_s12 = sadd.s32 4294967295, %s1026_s11   ;;  %p838_p0 = scmp.ge.s32.totalorder %s1026_s11, 1  ;;  %s1026_s11 = sphi %s1087_s11, %s22_s11  }
   0x5   : > { %p247_p1 = scmp.lt.s32.totalorder %s1026_s11, 5  ;;  %s1028_s13 = smov [#allocation3]  }
   0x6   : > { %s265_s14 = sshll.u32 %s1028_s13, 4  ;;  %p1101_p3 = scmp.eq.s32.totalorder %s836_s12, 0  ;;  %s266_s14 = int_to_ptr.vmem [resolvable:$true] %s265_s14 }
   0x7   : > { %p1095_p2 = pnand %p838_p0, %p247_p1  ;;  %s988_s19 = scalar_lea.hbm %s1198_s3, 2048 }
   0x8   : > { %s1209_s15 = scalar_select %p1101_p3, 1, 0 }
   0x9   : > { %s1208_s8 = scalar_select %p1095_p2, 1, 0 }
   0xa   : > { %p938_p4 = pneg %p1095_p2  ;;  %p989_p6 = scmp.ne.s32.totalorder %s1198_s3, %s988_s19 }
   0xb   : > { %p995_p10 = scmp.lt.u32.totalorder %s988_s19, %s1198_s3 }
   0xc   : > { %p1109_p5 = pnand %p1101_p3, %p938_p4 }
   0xe   : > { %p990_p7 = pneg %p1109_p5 }
  0x10   : > { %p991_p8 = pnand %p990_p7, %p989_p6 }
  0x12   : > { %p992_p9 = pneg %p991_p8 }
  0x14   : > { %p997_p11 = pnand %p995_p10, %p992_p9 }
  0x16   : > { %1000 = shalt.err (!%p997_p11)
}
  0x17   : > { %s1001_s24 = scalar_lea.vmem %s266_s14, 2048  ;;  %p1009_p1 = scmp.lt.s32.totalorder %s266_s14, %s266_s14 }
  0x18   : > { %p1002_p12 = scmp.ne.s32.totalorder %s266_s14, %s1001_s24  ;;  %p1010_p4 = scmp.lt.s32.totalorder %s1001_s24, %s1001_s24 }
  0x1a   : > { %p1004_p13 = pnand %p1002_p12, %p990_p7  ;;  %p1011_p3 = por %p1010_p4, %p1009_p1 }
  0x1c   : > { %p1005_p0 = pneg %p1004_p13 }
  0x1e   : > { %p1012_p2 = pnand %p1011_p3, %p1005_p0 }
  0x20   : > { %1015 = shalt.err (!%p1012_p2)
}
  0x21   : > { %s1029_s25 = smov 64   ;;  %s1030_s26 = smov 4  }
  0x22   : > { %941 = dma.hbm_to_vmem [thread:$0]  (!%p1109_p5), %s1198_s3, 2048, %s266_s14, [#allocation4], %s1029_s25, %s1029_s25, %s1030_s26  }
  0x23   : > { %p1211_p6 = scmp.ne.s32.totalorder %s1208_s8, 0 }
  0x24   : > { %p1212_p8 = scmp.ne.s32.totalorder (!%p1211_p6), %s1209_s15, 0 }
  0x25   : > { %305 = sbr.rel (%p1211_p6) target bundleno = 866 (0x362), region = 56 }
  0x2c   : > { %1021 = dma.done.wait (%p1212_p8), [#allocation4], 2048  }
  0x2d   : > { %1023 = vsyncadd (%p1212_p8), [#allocation4], 4294965248  ;;  %s843_s29 = sshll.u32 %s836_s12, 1  ;;  %v1031_v1 = vmov 0   ;;  %v958_v2 = vld [vmem:[%s1196_s1 + $0x4] ss:$8 sps:$4 sm:$0xff]   ;;  %v361_v31 = vlaneseq }
  0x2e   : > { %434 = vmatprep.mubr.bf16.mxu0 %v1031_v1  ;;  %p342_p2 = scmp.lt.s32.totalorder %s843_s29, 7  ;;  %vm395_vm0 = vcmask 1041408   ;;  %v960_v3 = vld [vmem:[%s1196_s1] ss:$8 sps:$4 sm:$0xff]   ;;  %v358_v4 = vld [vmem:[%s1196_s1 + $0x10] sm:$0x33]  ;;  %402 = vmatprep.subr.bf16.mxu0 %v958_v2 }
  0x2f   : > { %v851_v5 = vcombine.high %v358_v4, %v358_v4  ;;  %v850_v6 = vcombine.low %v358_v4, %v358_v4  ;;  %403 = vmatpush1.bf16.msra.mxu0 %v960_v3  ;;  %v964_v7 = vld [vmem:[#allocation3 + $0x40] sm:$0xff]   ;;  %v966_v11 = vld [vmem:[#allocation3 + $0x48] sm:$0xff]   ;;  %vm391_vm1 = vcmask 162816   ;;  %v968_v13 = vld [vmem:[#allocation3 + $0x50] sm:$0xff]   ;;  %v1032_v26 = vmov 0.0  }
  0x30   : > { %s1214_s29 = smov (!%p342_p2, %s843_s29), 7  ;;  %v965_v10 = vld [vmem:[#allocation3] sm:$0xff]   ;;  %883 = vmatprep.subr.bf16.mxu1 %v964_v7  ;;  %v967_v12 = vld [vmem:[#allocation3 + $0x8] sm:$0xff]   ;;  %v969_v14 = vld [vmem:[#allocation3 + $0x10] sm:$0xff]   ;;  %v362_v32 = vshrl.u32 %v361_v31, 7  ;;  %vm1033_vm2 = vmmov 0  }
  0x31   : > { %s844_s30 = sshll.u32 %s1214_s29, 2  ;;  %852 = vmatprep.subr.msk.bf16.mxu0 %vm395_vm0, %v851_v5  ;;  %v397_v8 = vsel %vm395_vm0, %v850_v6, 0  ;;  %884 = vmatpush3.bf16.msra.mxu1 %v965_v10  ;;  %v970_v15 = vld [vmem:[#allocation3 + $0x58] sm:$0xff]   ;;  %v972_v17 = vld [vmem:[#allocation3 + $0x60] sm:$0xff]   ;;  %v974_v19 = vld [vmem:[#allocation3 + $0x68] sm:$0xff]   ;;  %s846_s23 = sshll.u32 %s1214_s29, 3 }
  0x32   : > { %s345_s15 = scalar_lea.vmem %s1195_s0, %s844_s30  ;;  %885 = vmatprep.subr.bf16.mxu1 %v966_v11  ;;  %v971_v16 = vld [vmem:[#allocation3 + $0x18] sm:$0xff]   ;;  %v973_v18 = vld [vmem:[#allocation3 + $0x20] sm:$0xff]   ;;  %v975_v20 = vld [vmem:[#allocation3 + $0x28] sm:$0xff]   ;;  %v363_v33 = vsub.s32 0, %v362_v32  ;;  %v367_v35 = vsub.s32 1, %v362_v32  ;;  %s351_s26 = scalar_lea.vmem %s1204_s9, %s846_s23  ;;  %vm765_vm3 = vcmask 7168  }
  0x33   : > { %v963_v9 = vld [vmem:[%s345_s15] sm:$0xff]   ;;  %405 = vmatpush1.bf16.msra.mxu0 %v397_v8  ;;  %v976_v21 = vld [vmem:[#allocation3 + $0x70] sm:$0xff]   ;;  %v981_v27 = vld [vmem:[%s1200_s5 + $0x8] sm:$0xff]  }
  0x34   : > { %v977_v22 = vld [vmem:[#allocation3 + $0x30] sm:$0xff]   ;;  %v978_v23 = vld [vmem:[#allocation3 + $0x78] sm:$0xff]   ;;  %914 = vmatprep.subr.bf16.mxu0 %v1032_v26  ;;  %v985_v52 = vld [vmem:[%s1200_s5 + $0x28] sm:$0xff]  }
  0x35   : > { %886 = vmatpush3.bf16.msra.mxu1 %v967_v12  ;;  %v979_v24 = vld [vmem:[#allocation3 + $0x38] sm:$0xff]   ;;  %v982_v28 = vld [vmem:[%s1200_s5 + $0x10] sm:$0xff]  }
  0x36   : > { %853 = vmatmul.mubr.msk.bf16.vlgmr.msra.gmra.mrb[0].mxu0 %vm391_vm1, %v963_v9  ;;  %887 = vmatprep.subr.bf16.mxu1 %v968_v13  ;;  %v980_v25 = vld [vmem:[%s1200_s5] sm:$0xff]   ;;  %v983_v29 = vld [vmem:[%s1200_s5 + $0x18] sm:$0xff]   ;;  %v986_v53 = vld [vmem:[%s1200_s5 + $0x30] sm:$0xff]  }
  0x37   : > { %915 = vmatpush3.bf16.msra.mxu0 %v980_v25  ;;  %v984_v30 = vld [vmem:[%s1200_s5 + $0x20] sm:$0xff]   ;;  %v987_v54 = vld [vmem:[%s1200_s5 + $0x38] sm:$0xff]   ;;  %930 = vmatprep.mubr.msk.bf16.mxu0 %vm1033_vm2, %v1032_v26 }
  0x38   : > { %916 = vmatprep.subr.bf16.mxu0 %v1032_v26  ;;  %v359_v34 = vld [vmem:[%s1197_s2] sm:$0x3] }
  0x39   : > { %888 = vmatpush3.bf16.msra.mxu1 %v969_v14  ;;  %v364_v36 = vrot.slane %v359_v34, %v363_v33  ;;  %v368_v37 = vrot.slane %v359_v34, %v367_v35  ;;  %v854_v56 = vld [vmem:[%s1199_s4] ss:$0 sm:$0xff] }
  0x3a   : > { %889 = vmatprep.subr.bf16.mxu1 %v970_v15  ;;  %v744_v3 = vld [vmem:[%s1202_s7] sm:$0x1] }
  0x3b   : > { %917 = vmatpush3.bf16.msra.mxu0 %v981_v27  ;;  %v745_v4 = vunpack.c.l.bf16 %v744_v3  ;;  %v871_v5 = vld [vmem:[%s1201_s6] ss:$0 sm:$0xff] }
  0x3c   : > { %918 = vmatprep.subr.bf16.mxu0 %v1032_v26 }
  0x3d   : > { %890 = vmatpush3.bf16.msra.mxu1 %v971_v16  ;;  %v749_v9 = vrot.slane %v745_v4, %v363_v33 }
  0x3e   : > { %891 = vmatprep.subr.bf16.mxu1 %v972_v17  ;;  %v880_v17 = vld [vmem:[#allocation2] ss:$0 sm:$0xff] }
  0x3f   : > { %919 = vmatpush3.bf16.msra.mxu0 %v982_v28 }
  0x40   : > { %920 = vmatprep.subr.bf16.mxu0 %v1032_v26 }
  0x41   : > { %892 = vmatpush3.bf16.msra.mxu1 %v973_v18 }
  0x42   : > { %893 = vmatprep.subr.bf16.mxu1 %v974_v19 }
  0x43   : > { %921 = vmatpush3.bf16.msra.mxu0 %v983_v29 }
  0x44   : > { %922 = vmatprep.subr.bf16.mxu0 %v1032_v26 }
  0x45   : > { %894 = vmatpush3.bf16.msra.mxu1 %v975_v20 }
  0x46   : > { %895 = vmatprep.subr.bf16.mxu1 %v976_v21 }
  0x47   : > { %923 = vmatpush3.bf16.msra.mxu0 %v984_v30 }
  0x48   : > { %924 = vmatprep.subr.bf16.mxu0 %v1032_v26 }
  0x49   : > { %896 = vmatpush3.bf16.msra.mxu1 %v977_v22 }
  0x4a   : > { %897 = vmatprep.subr.bf16.mxu1 %v978_v23 }
  0x4b   : > { %925 = vmatpush3.bf16.msra.mxu0 %v985_v52 }
  0x4c   : > { %926 = vmatprep.subr.bf16.mxu0 %v1032_v26 }
  0x4d   : > { %898 = vmatpush3.bf16.msra.mxu1 %v979_v24 }
  0x4f   : > { %927 = vmatpush3.bf16.msra.mxu0 %v986_v53 }
  0x50   : > { %928 = vmatprep.subr.bf16.mxu0 %v1032_v26 }
  0x53   : > { %929 = vmatpush3.bf16.msra.mxu0 %v987_v54 }
 0x109   : > { %v436_v38 = vpop.f32.mrb[0].mxu0 }
 0x10a   : > { %v437_v39 = vadd.f32 %v436_v38, %v364_v36  ;;  %v438_v40 = vpop.f32.mrb[1].mxu0 }
 0x10b   : > { %v439_v41 = vadd.f32 %v438_v40, %v368_v37  ;;  %v440_v42 = vpop.f32.mrb[2].mxu0 }
 0x10c   : > { %v441_v43 = vadd.f32 %v440_v42, %v364_v36  ;;  %v442_v44 = vpop.f32.mrb[3].mxu0  ;;  %v445_v46 = vmax.f32 %v437_v39, 0.0 }
 0x10d   : > { %v443_v45 = vadd.f32 %v442_v44, %v368_v37  ;;  %v446_v48 = vmax.f32 %v439_v41, 0.0 }
 0x10e   : > { %v447_v47 = vmax.f32 %v441_v43, 0.0 }
 0x10f   : > { %v448_v49 = vmax.f32 %v443_v45, 0.0 }
 0x110   : > { %v449_v50 = vpack.c.bf16 %v447_v47, %v445_v46 }
 0x111   : > { %v450_v51 = vpack.c.bf16 %v448_v49, %v446_v48 }
 0x113   : > { %618 = vmatprep.mubr.bf16.mxu1 %v450_v51 }
 0x114   : > { %619 = vmatmul.mubr.bf16.vlgmr.msra.gmra.mrb[0].mxu1 %v449_v50 }
 0x1e7   : > { %v899_v55 = vpop.f32.mrb[0].mxu1 }
 0x1e8   : > { %v900_v57 = vpop.f32.mrb[1].mxu1 }
 0x1e9   : > { %v901_v58 = vadd.f32 %v900_v57, %v899_v55  ;;  %v902_v59 = vpop.f32.mrb[2].mxu1 }
 0x1ea   : > { %v903_v60 = vpop.f32.mrb[3].mxu1 }
 0x1eb   : > { %v621_v61 = vadd.f32 %v901_v58, %v854_v56  ;;  %v904_v62 = vadd.f32 %v903_v60, %v902_v59 }
 0x1ed   : > { %v624_v63 = vadd.f32 %v904_v62, %v854_v56  ;;  %v627_v0 = vmax.f32 %v621_v61, 0.0 }
 0x1ef   : > { %v628_v1 = vmax.f32 %v624_v63, 0.0 }
 0x1f1   : > { %v629_v2 = vpack.c.bf16 %v628_v1, %v627_v0 }
 0x1f3   : > { %931 = vmatmul.mubr.bf16.vlgmr.msra.gmra.mrb[4].mxu0 %v629_v2 }
 0x2c6   : > { %v735_v6 = vpop.f32.mrb[4].mxu0 }
 0x2c7   : > { %v736_v7 = vadd.f32 %v871_v5, %v735_v6  ;;  %v932_v8 = vpop.f32.mrb[5].mxu0 }
 0x2c8   : > { %v738_v10 = vpop.f32.mrb[6].mxu0 }
 0x2c9   : > { %v742_v11 = vmax.f32 %v736_v7, 0.0  ;;  %v739_v12 = vadd.f32 %v871_v5, %v738_v10  ;;  %v933_v13 = vpop.f32.mrb[7].mxu0 }
 0x2cb   : > { %v743_v14 = vmax.f32 %v739_v12, 0.0  ;;  %v750_v15 = vmul.f32 %v749_v9, %v742_v11 }
 0x2cd   : > { %752 = vadd.xlane.f32.xlu0 %v750_v15  ;;  %v751_v16 = vmul.f32 %v749_v9, %v743_v14 }
 0x2d1   : > { %754 = vadd.xlane.f32.xlu0 %v751_v16 }
 0x35a   : > { %v753_v18 = vpop.xlane.xlu0 %752 }
 0x35b   : > { %v763_v19 = vadd.f32 %v880_v17, %v753_v18 }
 0x35d   : > { %766 = vst.msk [vmem:[%s351_s26] sm:$0xff] %vm765_vm3, %v763_v19 }
 0x35e   : > { %v755_v20 = vpop.xlane.xlu0 %754 }
 0x35f   : > { %v764_v21 = vadd.f32 %v880_v17, %v755_v20 }
 0x361   : > { %767 = vst.msk [vmem:[%s351_s26 + $0x8] sm:$0xff] %vm765_vm3, %v764_v21 }
 0x362 PF: > { %s22_s11 = sadd.s32 1, %s1026_s11  }
 0x363   : > { %p19_p3 = scmp.ge.s32.totalorder %s22_s11, 6  }
 0x365   :  { %21 = sbr.rel (!%p19_p3) target bundleno = 4 (0x4), region = 91 }
 0x36c   :  { %790 = vsyncpa [#allocation4], 1 }
 0x36d   :  { %792 = vsyncpa [#allocation4 + $0x1], 1 }

</bundles_post_ra>
